<compile_context>
chip_gen: v5e
topology: v5e:2x2
jax: 0.10.0
libtpu: 0.0.40
codegen_flags: <defaults>
</compile_context>

<pallas_src>
import functools

import jax
import jax.numpy as jnp
from jax.experimental import pallas as pl
from jax.experimental.pallas import tpu as pltpu


def _round_up(x, m):
    return ((x + m - 1) // m) * m


# ----------------------------------------------------------------------------- kernel
def _mlp_multihead_fused_kernel(x_ref, w1_ref, b1_ref, w2_ref, b2_ref,
                                w3_ref, b3_ref, o_ref, *, compute_dtype):
    # x tile: (TILE_B, n_in).  Weights/biases are VMEM-resident across grid steps.
    x = x_ref[...]
    if x.dtype != compute_dtype:
        x = x.astype(compute_dtype)          # no-op when obs already arrives in bf16

    # Layer 1: both heads fused along the output dim -> one MXU matmul.
    h = jnp.dot(x, w1_ref[...], preferred_element_type=jnp.float32)
    h = jnp.maximum(h + b1_ref[...], 0.0)    # f32 epilogue (v5e VPU has no bf16)

    # Layer 2: block-diagonal fused weight -> one matmul.
    h = jnp.dot(h.astype(compute_dtype), w2_ref[...],
                preferred_element_type=jnp.float32)
    h = jnp.maximum(h + b2_ref[...], 0.0)

    # Layer 3: block-diagonal; produces both heads packed along the lane dim.
    o = jnp.dot(h.astype(compute_dtype), w3_ref[...],
                preferred_element_type=jnp.float32) + b3_ref[...]
    o_ref[...] = o.astype(o_ref.dtype)


# ----------------------------------------------------------------------------- param packing
def pack_multihead_params(params_1, params_2, compute_dtype=jnp.bfloat16):
    """Fuse the two heads' params into 3 matmuls.

    Layer 1: concat along output dim.  Layers 2/3: block-diagonal packing.
    Fused hidden dim zero-padded to a multiple of 128; padded activation columns
    are exactly zero (zero weights + zero bias, ReLU(0)=0), so semantics match the
    two separate PyTorch heads.  Matmul operands are stored in `compute_dtype`
    (bf16 default -> native MXU path); biases stay f32 (added to f32 accumulator).
    For the torch-default width=100, hid = 200 -> hid_p = 256 (MXU-native on
    v6e/v7x, two clean 128-deep K passes on v5e); don't pad further.
    """
    w1a, b1a, w2a, b2a, w3a, b3a = params_1
    w1b, b1b, w2b, b2b, w3b, b3b = params_2
    n_in = w1a.shape[0]
    wa, wb = w1a.shape[1], w1b.shape[1]
    no1, no2 = w3a.shape[1], w3b.shape[1]
    hid = wa + wb
    hid_p = _round_up(hid, 128)

    w1 = jnp.zeros((n_in, hid_p), jnp.float32)
    w1 = w1.at[:, :wa].set(w1a).at[:, wa:hid].set(w1b)
    b1 = jnp.zeros((1, hid_p), jnp.float32)
    b1 = b1.at[:, :wa].set(b1a.reshape(1, -1)).at[:, wa:hid].set(b1b.reshape(1, -1))

    w2 = jnp.zeros((hid_p, hid_p), jnp.float32)
    w2 = w2.at[:wa, :wa].set(w2a).at[wa:hid, wa:hid].set(w2b)
    b2 = jnp.zeros((1, hid_p), jnp.float32)
    b2 = b2.at[:, :wa].set(b2a.reshape(1, -1)).at[:, wa:hid].set(b2b.reshape(1, -1))

    w3 = jnp.zeros((hid_p, no1 + no2), jnp.float32)
    w3 = w3.at[:wa, :no1].set(w3a).at[wa:hid, no1:].set(w3b)
    b3 = jnp.concatenate([b3a.reshape(1, -1), b3b.reshape(1, -1)], axis=1)

    fused = (w1.astype(compute_dtype), b1,
             w2.astype(compute_dtype), b2,
             w3.astype(compute_dtype), b3)
    return fused, (no1, no2)


# ----------------------------------------------------------------------------- tiling
def _choose_tile_b(B, tile_b):
    """Batch tile selection.

    VMEM is not the constraint at these feature sizes, so:
      * use big tiles (~1024 rows/step target) to amortize the ~0.35 us/step
        pipeline overhead,
      * keep an even number (>=2) of grid steps whenever B allows it so the
        "parallel" batch axis can be sharded across both v7x TensorCores with
        balanced load,
      * size the tile from B (round_up(cdiv(B, steps), 8)) so the last tile
        wastes at most 7 padded rows instead of up to tile_b-1.
    """
    if tile_b is not None:
        return max(8, _round_up(min(tile_b, B), 8))
    target = 1024
    if B <= 16:
        return max(8, _round_up(B, 8))
    steps = max(2, 2 * pl.cdiv(pl.cdiv(B, target), 2))   # even step count >= 2
    return _round_up(pl.cdiv(B, steps), 8)


# ----------------------------------------------------------------------------- forward
def mlp_multihead_forward(obs, fused_params, out_dims, *,
                          compute_dtype=jnp.bfloat16, out_dtype=jnp.float32,
                          tile_b=None):
    """obs: (B, n_inputs), any float dtype (bf16 obs halves the dominant input
    stream).  fused_params from pack_multihead_params.  Returns (out1, out2)."""
    w1, b1, w2, b2, w3, b3 = fused_params
    no1, no2 = out_dims
    B, n_in = obs.shape
    n_out = no1 + no2
    hid_p = w2.shape[0]

    tile_b = _choose_tile_b(B, tile_b)
    b_pad = _round_up(B, tile_b)
    if b_pad != B:
        obs = jnp.pad(obs, ((0, b_pad - B), (0, 0)))   # zero rows; sliced off below
    grid = (b_pad // tile_b,)

    kernel = functools.partial(_mlp_multihead_fused_kernel,
                               compute_dtype=compute_dtype)

    const = lambda i: (0, 0)   # weights/biases: same block every step (loaded once)
    # Resident params get a single buffer (no point double-buffering a constant block).
    resident = lambda a: pl.BlockSpec(a.shape, const, pipeline_mode=pl.Buffered(1))

    # Advisory cost so XLA can overlap surrounding ops with this short call.
    flops = 2 * b_pad * (n_in * hid_p + hid_p * hid_p + hid_p * n_out)
    weight_bytes = sum(int(a.size) * a.dtype.itemsize for a in fused_params)
    bytes_accessed = (b_pad * n_in * obs.dtype.itemsize
                      + b_pad * n_out * jnp.dtype(out_dtype).itemsize
                      + weight_bytes)

    out = pl.pallas_call(
        kernel,
        out_shape=jax.ShapeDtypeStruct((b_pad, n_out), out_dtype),
        grid=grid,
        in_specs=[
            pl.BlockSpec((tile_b, n_in), lambda i: (i, 0)),   # obs: streamed, double-buffered
            resident(w1), resident(b1),
            resident(w2), resident(b2),
            resident(w3), resident(b3),
        ],
        out_specs=pl.BlockSpec((tile_b, n_out), lambda i: (i, 0)),
        compiler_params=pltpu.CompilerParams(
            dimension_semantics=("parallel",)),               # 2-TC sharding on v7x
        cost_estimate=pl.CostEstimate(flops=flops, transcendentals=0,
                                      bytes_accessed=bytes_accessed),
    )(obs, w1, b1, w2, b2, w3, b3)

    out = out[:B]
    return out[:, :no1], out[:, no1:]


# ----------------------------------------------------------------------------- init (matches torch orthogonal_ + zero bias)
def _orthogonal(key, shape, gain):
    rows, cols = shape
    n = max(rows, cols)
    a = jax.random.normal(key, (n, n), dtype=jnp.float32)
    q, r = jnp.linalg.qr(a)
    q = q * jnp.sign(jnp.diag(r))[None, :]   # sign-consistent decomposition
    return (gain * q[:rows, :cols]).astype(jnp.float32)


def make_head_params(key, n_inputs, width, n_outputs, weight_scale):
    k1, k2, k3 = jax.random.split(key, 3)
    # PyTorch Linear weight is (out, in); we store transposed (in, out).
    w1 = _orthogonal(k1, (width, n_inputs), weight_scale).T
    w2 = _orthogonal(k2, (width, width), weight_scale).T
    w3 = _orthogonal(k3, (n_outputs, width), weight_scale).T
    b1 = jnp.zeros((1, width), jnp.float32)
    b2 = jnp.zeros((1, width), jnp.float32)
    b3 = jnp.zeros((1, n_outputs), jnp.float32)
    return (w1, b1, w2, b2, w3, b3)


# ----------------------------------------------------------------------------- references
def _ref_head(x, params):
    w1, b1, w2, b2, w3, b3 = params
    h = jnp.maximum(x @ w1 + b1, 0.0)
    h = jnp.maximum(h @ w2 + b2, 0.0)
    return h @ w3 + b3


def _ref_head_lowp(x, params, dtype):
    # Emulates the bf16-operand / f32-accumulation path for tolerance checks.
    w1, b1, w2, b2, w3, b3 = params
    def mm(a, w):
        return jnp.dot(a.astype(dtype), w.astype(dtype),
                       preferred_element_type=jnp.float32)
    h = jnp.maximum(mm(x, w1) + b1, 0.0)
    h = jnp.maximum(mm(h, w2) + b2, 0.0)
    return mm(h, w3) + b3


if __name__ == "__main__":
    n_inputs = 16
    width = 32          # "width" hyperparameter (torch default 100; kept small here)
    n_outputs_1 = 4
    n_outputs_2 = 6
    weight_scale = 3.0

    key = jax.random.PRNGKey(0)
    k_obs, k_h1, k_h2, k_obs2 = jax.random.split(key, 4)

    params_1 = make_head_params(k_h1, n_inputs, width, n_outputs_1, weight_scale)
    params_2 = make_head_params(k_h2, n_inputs, width, n_outputs_2, weight_scale)

    # ---- small batch, f32 operand path: exact semantics of the PyTorch module ----
    batch = 8
    obs = jax.random.normal(k_obs, (batch, n_inputs), dtype=jnp.float32)
    fused_f32, dims = pack_multihead_params(params_1, params_2,
                                            compute_dtype=jnp.float32)
    o1, o2 = mlp_multihead_forward(obs, fused_f32, dims,
                                   compute_dtype=jnp.float32)
    o1 = jax.block_until_ready(o1)
    o2 = jax.block_until_ready(o2)
    r1 = _ref_head(obs, params_1)
    r2 = _ref_head(obs, params_2)
    assert o1.shape == (batch, n_outputs_1) and o2.shape == (batch, n_outputs_2)
    assert jnp.allclose(o1, r1, atol=2e-3, rtol=2e-3)
    assert jnp.allclose(o2, r2, atol=2e-3, rtol=2e-3)

    # ---- production path: bf16 operands (native MXU), f32 accumulation ----
    fused_bf16, dims = pack_multihead_params(params_1, params_2)   # bf16 default
    q1, q2 = mlp_multihead_forward(obs, fused_bf16, dims)          # bf16 default
    q1 = jax.block_until_ready(q1)
    q2 = jax.block_until_ready(q2)
    s1 = _ref_head_lowp(obs, params_1, jnp.bfloat16)
    s2 = _ref_head_lowp(obs, params_2, jnp.bfloat16)
    assert jnp.allclose(q1, s1, atol=1e-2, rtol=1e-2)
    assert jnp.allclose(q2, s2, atol=1e-2, rtol=1e-2)

    # ---- non-divisible batch: exercises multi-step grid + tail padding path ----
    batch2 = 100
    obs2 = jax.random.normal(k_obs2, (batch2, n_inputs), dtype=jnp.float32)
    t1, t2 = mlp_multihead_forward(obs2, fused_bf16, dims)
    t1 = jax.block_until_ready(t1)
    t2 = jax.block_until_ready(t2)
    u1 = _ref_head_lowp(obs2, params_1, jnp.bfloat16)
    u2 = _ref_head_lowp(obs2, params_2, jnp.bfloat16)
    assert t1.shape == (batch2, n_outputs_1) and t2.shape == (batch2, n_outputs_2)
    assert jnp.allclose(t1, u1, atol=1e-2, rtol=1e-2)
    assert jnp.allclose(t2, u2, atol=1e-2, rtol=1e-2)

    print("KERNEL_OK")
</pallas_src>

<mosaic_0001>
module attributes {stable_mosaic.version = 11 : i64} {
  func.func @_mlp_multihead_fused_kernel(%arg0: i32, %arg1: memref<8x16xf32, #tpu.memory_space<vmem>>, %arg2: memref<16x128xf32, #tpu.memory_space<vmem>>, %arg3: memref<1x128xf32, #tpu.memory_space<vmem>>, %arg4: memref<128x128xf32, #tpu.memory_space<vmem>>, %arg5: memref<1x128xf32, #tpu.memory_space<vmem>>, %arg6: memref<128x10xf32, #tpu.memory_space<vmem>>, %arg7: memref<1x10xf32, #tpu.memory_space<vmem>>, %arg8: memref<8x10xf32, #tpu.memory_space<vmem>>) attributes {dimension_semantics = [#tpu.dimension_semantics<parallel>], iteration_bounds = array<i64: 1>, scalar_prefetch = 0 : i64, scratch_operands = 0 : i64, tpu.core_type = #tpu.core_type<tc>, window_params = [{transform_indices = @transform_0, window_bounds = array<i64: 8, 16>}, {pipeline_mode = #tpu.pipeline_mode<synchronous>, transform_indices = @transform_1, window_bounds = array<i64: 16, 128>}, {pipeline_mode = #tpu.pipeline_mode<synchronous>, transform_indices = @transform_2, window_bounds = array<i64: 1, 128>}, {pipeline_mode = #tpu.pipeline_mode<synchronous>, transform_indices = @transform_3, window_bounds = array<i64: 128, 128>}, {pipeline_mode = #tpu.pipeline_mode<synchronous>, transform_indices = @transform_4, window_bounds = array<i64: 1, 128>}, {pipeline_mode = #tpu.pipeline_mode<synchronous>, transform_indices = @transform_5, window_bounds = array<i64: 128, 10>}, {pipeline_mode = #tpu.pipeline_mode<synchronous>, transform_indices = @transform_6, window_bounds = array<i64: 1, 10>}, {transform_indices = @transform_7, window_bounds = array<i64: 8, 10>}]} {
    %c0 = arith.constant 0 : index
    %c0_0 = arith.constant 0 : index
    %0 = vector.load %arg1[%c0, %c0_0] : memref<8x16xf32, #tpu.memory_space<vmem>>, vector<8x16xf32>
    %c0_1 = arith.constant 0 : index
    %c0_2 = arith.constant 0 : index
    %1 = vector.load %arg2[%c0_1, %c0_2] : memref<16x128xf32, #tpu.memory_space<vmem>>, vector<16x128xf32>
    %cst = arith.constant dense<0.000000e+00> : vector<8x128xf32>
    %2 = tpu.matmul %0, %1, %cst {dimension_numbers = #tpu.dot_dimension_numbers<[1], [0], [0], [1], [0, 0, 1, 1], [], []>} : vector<8x16xf32>, vector<16x128xf32>, vector<8x128xf32> -> vector<8x128xf32>
    %c0_3 = arith.constant 0 : index
    %c0_4 = arith.constant 0 : index
    %3 = vector.load %arg3[%c0_3, %c0_4] : memref<1x128xf32, #tpu.memory_space<vmem>>, vector<1x128xf32>
    %4 = vector.broadcast %3 : vector<1x128xf32> to vector<8x128xf32>
    %5 = arith.addf %2, %4 : vector<8x128xf32>
    %cst_5 = arith.constant 0.000000e+00 : f32
    %6 = vector.broadcast %cst_5 : f32 to vector<8x128xf32>
    %7 = arith.maximumf %5, %6 : vector<8x128xf32>
    %c0_6 = arith.constant 0 : index
    %c0_7 = arith.constant 0 : index
    %8 = vector.load %arg4[%c0_6, %c0_7] : memref<128x128xf32, #tpu.memory_space<vmem>>, vector<128x128xf32>
    %cst_8 = arith.constant dense<0.000000e+00> : vector<8x128xf32>
    %9 = tpu.matmul %7, %8, %cst_8 {dimension_numbers = #tpu.dot_dimension_numbers<[1], [0], [0], [1], [0, 0, 1, 1], [], []>} : vector<8x128xf32>, vector<128x128xf32>, vector<8x128xf32> -> vector<8x128xf32>
    %c0_9 = arith.constant 0 : index
    %c0_10 = arith.constant 0 : index
    %10 = vector.load %arg5[%c0_9, %c0_10] : memref<1x128xf32, #tpu.memory_space<vmem>>, vector<1x128xf32>
    %11 = vector.broadcast %10 : vector<1x128xf32> to vector<8x128xf32>
    %12 = arith.addf %9, %11 : vector<8x128xf32>
    %cst_11 = arith.constant 0.000000e+00 : f32
    %13 = vector.broadcast %cst_11 : f32 to vector<8x128xf32>
    %14 = arith.maximumf %12, %13 : vector<8x128xf32>
    %c0_12 = arith.constant 0 : index
    %c0_13 = arith.constant 0 : index
    %15 = vector.load %arg6[%c0_12, %c0_13] : memref<128x10xf32, #tpu.memory_space<vmem>>, vector<128x10xf32>
    %cst_14 = arith.constant dense<0.000000e+00> : vector<8x10xf32>
    %16 = tpu.matmul %14, %15, %cst_14 {dimension_numbers = #tpu.dot_dimension_numbers<[1], [0], [0], [1], [0, 0, 1, 1], [], []>} : vector<8x128xf32>, vector<128x10xf32>, vector<8x10xf32> -> vector<8x10xf32>
    %c0_15 = arith.constant 0 : index
    %c0_16 = arith.constant 0 : index
    %17 = vector.load %arg7[%c0_15, %c0_16] : memref<1x10xf32, #tpu.memory_space<vmem>>, vector<1x10xf32>
    %18 = vector.broadcast %17 : vector<1x10xf32> to vector<8x10xf32>
    %19 = arith.addf %16, %18 : vector<8x10xf32>
    %c0_17 = arith.constant 0 : index
    %c0_18 = arith.constant 0 : index
    %20 = vector.load %arg8[%c0_17, %c0_18] : memref<8x10xf32, #tpu.memory_space<vmem>>, vector<8x10xf32>
    tpu.vector_store %arg8[%c0_17, %c0_18], %19 {strides = array<i32>} : memref<8x10xf32, #tpu.memory_space<vmem>>, vector<8x10xf32>,
    return
  }
  func.func @transform_0(%arg0: i32) -> (i32, i32) {
    %c0_i32 = arith.constant 0 : i32
    %c0_i32_0 = arith.constant 0 : i32
    return %arg0, %c0_i32 : i32, i32
  }
  func.func @transform_1(%arg0: i32) -> (i32, i32) {
    %c0_i32 = arith.constant 0 : i32
    %c0_i32_0 = arith.constant 0 : i32
    %c0_i32_1 = arith.constant 0 : i32
    return %c0_i32, %c0_i32_0 : i32, i32
  }
  func.func @transform_2(%arg0: i32) -> (i32, i32) {
    %c0_i32 = arith.constant 0 : i32
    %c0_i32_0 = arith.constant 0 : i32
    %c0_i32_1 = arith.constant 0 : i32
    return %c0_i32, %c0_i32_0 : i32, i32
  }
  func.func @transform_3(%arg0: i32) -> (i32, i32) {
    %c0_i32 = arith.constant 0 : i32
    %c0_i32_0 = arith.constant 0 : i32
    %c0_i32_1 = arith.constant 0 : i32
    return %c0_i32, %c0_i32_0 : i32, i32
  }
  func.func @transform_4(%arg0: i32) -> (i32, i32) {
    %c0_i32 = arith.constant 0 : i32
    %c0_i32_0 = arith.constant 0 : i32
    %c0_i32_1 = arith.constant 0 : i32
    return %c0_i32, %c0_i32_0 : i32, i32
  }
  func.func @transform_5(%arg0: i32) -> (i32, i32) {
    %c0_i32 = arith.constant 0 : i32
    %c0_i32_0 = arith.constant 0 : i32
    %c0_i32_1 = arith.constant 0 : i32
    return %c0_i32, %c0_i32_0 : i32, i32
  }
  func.func @transform_6(%arg0: i32) -> (i32, i32) {
    %c0_i32 = arith.constant 0 : i32
    %c0_i32_0 = arith.constant 0 : i32
    %c0_i32_1 = arith.constant 0 : i32
    return %c0_i32, %c0_i32_0 : i32, i32
  }
  func.func @transform_7(%arg0: i32) -> (i32, i32) {
    %c0_i32 = arith.constant 0 : i32
    %c0_i32_0 = arith.constant 0 : i32
    return %arg0, %c0_i32 : i32, i32
  }
}

</mosaic_0001>

<bundles_post_ra>
// kernel: tpu_custom_call.1
= control target key start
LH: loop header
LB: loop body
LE: loop exit
PB: predicated region body
PF: predicated region fallthrough
CT: control target
= control target key end

     0   :  { %12 = vsyncpa [#allocation3], 0  ;;  %s390_s0 = inlined_call_operand.hbm [shape: f32[8,16], index: 0, kind: input, shape index: {}]   ;;  %s391_s1 = inlined_call_operand.vmem [shape: f32[16,128], index: 1, kind: input, shape index: {}]   ;;  %s392_s2 = inlined_call_operand.vmem [shape: f32[1,128], index: 2, kind: input, shape index: {}]   ;;  %s393_s3 = inlined_call_operand.vmem [shape: f32[128,128], index: 3, kind: input, shape index: {}]   ;;  %s394_s4 = inlined_call_operand.vmem [shape: f32[1,128], index: 4, kind: input, shape index: {}]   ;;  %s395_s5 = inlined_call_operand.vmem [shape: f32[128,10], index: 5, kind: input, shape index: {}]   ;;  %s396_s6 = inlined_call_operand.vmem [shape: f32[1,10], index: 6, kind: input, shape index: {}]   ;;  %s397_s7 = inlined_call_operand.hbm [shape: f32[8,10], index: 7, kind: output, shape index: {}]  }
   0x1   :  { %13 = vsyncpa [#allocation4], 0  ;;  %s19_s26 = sshll.u32 %s390_s0, 4  ;;  %s231_s27 = smov [#allocation2]   ;;  %s20_s26 = int_to_ptr.hbm [resolvable:$true] %s19_s26 }
   0x2   :  { %s21_s28 = sshll.u32 %s231_s27, 4  ;;  %s22_s28 = int_to_ptr.vmem [resolvable:$true] %s21_s28 }
   0x3   :  { %24 = dma.hbm_to_vmem [thread:$0]  %s20_s26, 128, %s22_s28, [#allocation3]  }
   0x4   :  { %227 = dma.done.wait [#allocation3], 128  }
   0x5   :  { %228 = vsyncadd [#allocation3], 4294967168  ;;  %v43_v0 = vld [vmem:[%s391_s1 + $0x8] sm:$0xff]  ;;  %v42_v1 = vld [vmem:[%s391_s1] sm:$0xff]  ;;  %vm48_vm0 = vcmask 130048   ;;  %s232_s25 = smov [#allocation5]  }
   0x6   :  { %66 = vmatpush.msra.mxu0 %v43_v0  ;;  %v41_v2 = vld [vmem:[#allocation2] sm:$0xff]  ;;  %v88_v3 = vld [vmem:[%s393_s3 + $0x78] sm:$0xff]  ;;  %v87_v4 = vld [vmem:[%s393_s3 + $0x70] sm:$0xff]  ;;  %s161_s26 = sshll.u32 %s232_s25, 4  ;;  %s163_s29 = sshll.u32 %s397_s7, 4  ;;  %vm154_vm1 = vcmask 80896   ;;  %s162_s26 = int_to_ptr.vmem [resolvable:$true] %s161_s26  ;;  %s164_s29 = int_to_ptr.hbm [resolvable:$true] %s163_s29 }
   0x7   :  { %93 = vmatpush.msra.mxu1 %v88_v3  ;;  %v86_v5 = vld [vmem:[%s393_s3 + $0x68] sm:$0xff]  ;;  %v85_v6 = vld [vmem:[%s393_s3 + $0x60] sm:$0xff]  ;;  %v84_v7 = vld [vmem:[%s393_s3 + $0x58] sm:$0xff] }
   0x8   :  { %67 = vmatpush.msra.mxu0 %v42_v1  ;;  %v83_v8 = vld [vmem:[%s393_s3 + $0x50] sm:$0xff]  ;;  %v82_v9 = vld [vmem:[%s393_s3 + $0x48] sm:$0xff]  ;;  %v81_v10 = vld [vmem:[%s393_s3 + $0x40] sm:$0xff] }
   0x9   :  { %173 = vmatmul.msk.f32.vlgmr.msra.gmra.mxu0 %vm48_vm0, %v41_v2  ;;  %94 = vmatpush.msra.mxu1 %v87_v4  ;;  %v80_v11 = vld [vmem:[%s393_s3 + $0x38] sm:$0xff]  ;;  %v79_v12 = vld [vmem:[%s393_s3 + $0x30] sm:$0xff]  ;;  %v78_v13 = vld [vmem:[%s393_s3 + $0x28] sm:$0xff] }
   0xa   :  { %v77_v14 = vld [vmem:[%s393_s3 + $0x20] sm:$0xff]  ;;  %v76_v15 = vld [vmem:[%s393_s3 + $0x18] sm:$0xff]  ;;  %v75_v16 = vld [vmem:[%s393_s3 + $0x10] sm:$0xff] }
   0xb   :  { %95 = vmatpush.msra.mxu1 %v86_v5  ;;  %v74_v17 = vld [vmem:[%s393_s3 + $0x8] sm:$0xff]  ;;  %v73_v18 = vld [vmem:[%s393_s3] sm:$0xff]  ;;  %v129_v19 = vld [vmem:[%s395_s5 + $0x78] sm:$0xff] }
   0xc   :  { %v128_v20 = vld [vmem:[%s395_s5 + $0x70] sm:$0xff]  ;;  %134 = vmatpush.msra.mxu2 %v129_v19  ;;  %v127_v21 = vld [vmem:[%s395_s5 + $0x68] sm:$0xff]  ;;  %v126_v22 = vld [vmem:[%s395_s5 + $0x60] sm:$0xff] }
   0xd   :  { %96 = vmatpush.msra.mxu1 %v85_v6  ;;  %v125_v23 = vld [vmem:[%s395_s5 + $0x58] sm:$0xff]  ;;  %v124_v24 = vld [vmem:[%s395_s5 + $0x50] sm:$0xff]  ;;  %v123_v25 = vld [vmem:[%s395_s5 + $0x48] sm:$0xff] }
   0xe   :  { %135 = vmatpush.msra.mxu2 %v128_v20  ;;  %v122_v26 = vld [vmem:[%s395_s5 + $0x40] sm:$0xff]  ;;  %v121_v27 = vld [vmem:[%s395_s5 + $0x38] sm:$0xff]  ;;  %v120_v28 = vld [vmem:[%s395_s5 + $0x30] sm:$0xff] }
   0xf   :  { %97 = vmatpush.msra.mxu1 %v84_v7  ;;  %v119_v29 = vld [vmem:[%s395_s5 + $0x28] sm:$0xff]  ;;  %v118_v30 = vld [vmem:[%s395_s5 + $0x20] sm:$0xff]  ;;  %v117_v31 = vld [vmem:[%s395_s5 + $0x18] sm:$0xff] }
  0x10   :  { %136 = vmatpush.msra.mxu2 %v127_v21  ;;  %v176_v32 = vld [vmem:[%s392_s2] ss:$0 sm:$0xff]  ;;  %v116_v36 = vld [vmem:[%s395_s5 + $0x10] sm:$0xff]  ;;  %v115_v37 = vld [vmem:[%s395_s5 + $0x8] sm:$0xff] }
  0x11   :  { %98 = vmatpush.msra.mxu1 %v83_v8  ;;  %v114_v38 = vld [vmem:[%s395_s5] sm:$0xff] }
  0x12   :  { %137 = vmatpush.msra.mxu2 %v126_v22  ;;  %v177_v39 = vld [vmem:[%s394_s4] ss:$0 sm:$0xff] }
  0x13   :  { %99 = vmatpush.msra.mxu1 %v82_v9  ;;  %v178_v43 = vld [vmem:[%s396_s6] ss:$0 sm:$0xff] }
  0x14   :  { %138 = vmatpush.msra.mxu2 %v125_v23 }
  0x15   :  { %100 = vmatpush.msra.mxu1 %v81_v10 }
  0x16   :  { %139 = vmatpush.msra.mxu2 %v124_v24 }
  0x17   :  { %101 = vmatpush.msra.mxu1 %v80_v11 }
  0x18   :  { %140 = vmatpush.msra.mxu2 %v123_v25 }
  0x19   :  { %102 = vmatpush.msra.mxu1 %v79_v12 }
  0x1a   :  { %141 = vmatpush.msra.mxu2 %v122_v26 }
  0x1b   :  { %103 = vmatpush.msra.mxu1 %v78_v13 }
  0x1c   :  { %142 = vmatpush.msra.mxu2 %v121_v27 }
  0x1d   :  { %104 = vmatpush.msra.mxu1 %v77_v14 }
  0x1e   :  { %143 = vmatpush.msra.mxu2 %v120_v28 }
  0x1f   :  { %105 = vmatpush.msra.mxu1 %v76_v15 }
  0x20   :  { %144 = vmatpush.msra.mxu2 %v119_v29 }
  0x21   :  { %106 = vmatpush.msra.mxu1 %v75_v16 }
  0x22   :  { %145 = vmatpush.msra.mxu2 %v118_v30 }
  0x23   :  { %107 = vmatpush.msra.mxu1 %v74_v17 }
  0x24   :  { %146 = vmatpush.msra.mxu2 %v117_v31 }
  0x25   :  { %108 = vmatpush.msra.mxu1 %v73_v18 }
  0x26   :  { %147 = vmatpush.msra.mxu2 %v116_v36 }
  0x28   :  { %148 = vmatpush.msra.mxu2 %v115_v37 }
  0x2a   :  { %149 = vmatpush.msra.mxu2 %v114_v38 }
  0x86   :  { %v69_v33 = vpop.f32.mrf.mxu0 }
  0x87   :  { %v70_v34 = vadd.f32 %v176_v32, %v69_v33 }
  0x89   :  { %v72_v35 = vmax.f32 %v70_v34, 0.0 }
  0x8b   :  { %109 = vmatmul.f32.vlgmr.msra.gmra.mxu1 %v72_v35 }
 0x108   :  { %v110_v40 = vpop.f32.mrf.mxu1 }
 0x109   :  { %v111_v41 = vadd.f32 %v177_v39, %v110_v40 }
 0x10b   :  { %v113_v42 = vmax.f32 %v111_v41, 0.0 }
 0x10d   :  { %150 = vmatmul.f32.vlgmr.msra.gmra.mxu2 %v113_v42 }
 0x190   :  { %v151_v44 = vpop.f32.mrf.mxu2 }
 0x191   :  { %v152_v45 = vadd.f32 %v178_v43, %v151_v44 }
 0x193   :  { %155 = vst.msk [vmem:[#allocation5] sm:$0xff] %vm154_vm1, %v152_v45 }
 0x194   :  { %166 = dma.vmem_to_hbm [thread:$0]  %s162_s26, 128, %s164_s29, [#allocation4]  }
 0x195   :  { %229 = dma.done.wait [#allocation4], 128  }
 0x196   :  { %230 = vsyncadd [#allocation4], 4294967168 }
 0x197   :  { %171 = vsyncpa [#allocation3], 1 }
 0x198   :  { %172 = vsyncpa [#allocation4], 1 }

</bundles_post_ra>
